<compile_context>
chip_gen: v7x
topology: tpu7x:2x2x1
jax: 0.10.0
libtpu: 0.0.40
codegen_flags: <defaults>
</compile_context>

<pallas_src>
from functools import partial
from typing import Dict, Optional, Sequence

import jax
import jax.numpy as jnp
from jax.experimental import pallas as pl
from jax.experimental.pallas import tpu as pltpu


# ----------------------------------------------------------------------------
# Pallas kernel: fused KxK conv + bias + ReLU (channel-on-sublane layout)
# ----------------------------------------------------------------------------
def _conv_kernel(x_ref, w_ref, b_ref, o_ref, patch_ref, *, wp, ksize, mt):
    """B padded images per grid step, spatial dim flattened onto lanes.

    x_ref     : (B, Cin, L)        bf16  padded image, rows flattened (stride Wp)
    w_ref     : (Cout, K2*Cin)     bf16  tap-major folded weights
    b_ref     : (Cout, 1)          f32
    o_ref     : (B, Cout, M_pad)   f32   M_pad multiple of 128 (junk cols sliced
                                          off by the wrapper)
    patch_ref : (K2*Cin, mt)       bf16  VMEM scratch for the im2col patch

    Output column m corresponds to padded-grid position (h, w): m = h*Wp + w.
    Tap (kh, kw) needs input column m + kh*Wp + kw -- a uniform STATIC shift --
    so per M-tile we stack the ksize**2 shifted (Cin, mt) views on the sublane
    axis and run a single K = ksize*ksize*Cin MXU contraction.
    """
    b_imgs, cin, _ = x_ref.shape
    c_out = o_ref.shape[1]
    m_pad = o_ref.shape[2]
    n_tiles = m_pad // mt
    k2 = ksize * ksize

    # Hoisted once: weights (tiny, vreg resident) and lane-broadcast bias.
    wmat = w_ref[...]
    bias = jnp.broadcast_to(b_ref[...], (c_out, mt)).astype(jnp.float32)

    for bi in range(b_imgs):                 # images in this grid step (static)
        for j in range(n_tiles):             # spatial (lane) tiles (static)
            m0 = j * mt
            # In-kernel im2col: k2 statically shifted (Cin, mt) views -> patch.
            for t in range(k2):
                kh, kw = divmod(t, ksize)
                s = m0 + kh * wp + kw        # static per-tap lane shift
                patch_ref[t * cin:(t + 1) * cin, :] = x_ref[bi, :, s:s + mt]
            # One K = k2*Cin contraction per tile; f32 accumulation on the MXU.
            acc = jnp.dot(wmat, patch_ref[...],
                          preferred_element_type=jnp.float32)      # (Cout, mt)
            # Full-lane (unmasked) store: m0 and mt are multiples of 128.
            o_ref[bi, :, m0:m0 + mt] = jnp.maximum(acc + bias, 0.0)


def conv_bias_relu(x_flat, w2d, b2d, *, wp, ksize, m_pad, mt, b_imgs):
    """x_flat: (N_pad, Cin, L) bf16; w2d: (Cout, K2*Cin) bf16; b2d: (Cout,1) f32.

    Returns (N_pad, Cout, M_pad) f32 (columns >= H*Wp and w in [W, Wp) are junk).
    """
    n_pad, cin, l_in = x_flat.shape
    c_out = w2d.shape[0]
    k2c = ksize * ksize * cin
    grid = (n_pad // b_imgs,)

    flops = 2 * n_pad * m_pad * c_out * k2c
    bytes_accessed = (x_flat.size * x_flat.dtype.itemsize
                      + w2d.size * w2d.dtype.itemsize
                      + b2d.size * b2d.dtype.itemsize
                      + n_pad * c_out * m_pad * 4)

    return pl.pallas_call(
        partial(_conv_kernel, wp=wp, ksize=ksize, mt=mt),
        out_shape=jax.ShapeDtypeStruct((n_pad, c_out, m_pad), jnp.float32),
        grid=grid,
        in_specs=[
            # B whole padded images per step.  Last two block dims equal the
            # full array extents -> exempt from the (8,128) divisibility rule.
            pl.BlockSpec((b_imgs, cin, l_in), lambda i: (i, 0, 0)),
            # Grid-invariant weights / bias (constant index_map -> resident).
            pl.BlockSpec((c_out, k2c), lambda i: (0, 0)),
            pl.BlockSpec((c_out, 1), lambda i: (0, 0)),
        ],
        out_specs=pl.BlockSpec((b_imgs, c_out, m_pad), lambda i: (i, 0, 0)),
        scratch_shapes=[pltpu.VMEM((k2c, mt), jnp.bfloat16)],
        compiler_params=pltpu.CompilerParams(
            # Image-blocks are independent -> shard across v7x's two
            # TensorCores (no-op on v5e/v6e).
            dimension_semantics=("parallel",)),
        cost_estimate=pl.CostEstimate(
            flops=flops, transcendentals=0, bytes_accessed=bytes_accessed),
    )(x_flat, w2d, b2d)


# ----------------------------------------------------------------------------
# "Engine execution": minimal layout glue around the Pallas hot path
# ----------------------------------------------------------------------------
@partial(jax.jit, static_argnames=("ksize",))
def _run_engine(x_nchw, weight, bias, *, ksize):
    # The flat-row formulation below assumes odd ksize, stride 1, SAME padding.
    assert ksize % 2 == 1, "flat-row conv layout requires odd ksize (SAME, stride 1)"
    n, c, h, w = x_nchw.shape
    c_out = weight.shape[0]
    pad = ksize // 2
    hp, wp = h + 2 * pad, w + 2 * pad

    # ---- static geometry -----------------------------------------------------
    m_valid = h * wp                          # columns w in [W, Wp) are junk
    m128 = pl.cdiv(m_valid, 128)
    m_pad = m128 * 128                        # lane-padded output length
    mt = 128 * max(d for d in (4, 3, 2, 1) if m128 % d == 0)   # <=512, divides m_pad
    l_in = m_pad + 2 * pad * wp + 2 * pad     # covers the largest tap shift
    # Batch small images per grid step (amortize ~0.35us/step at min/opt profiles)
    b_imgs = max(1, min(n, 2048 // m_pad))
    n_pad = pl.cdiv(n, b_imgs) * b_imgs

    # ---- input glue: zero-pad (batch + spatial), flatten rows, cast ----------
    x_p = jnp.pad(x_nchw, ((0, n_pad - n), (0, 0), (pad, pad), (pad, pad)))
    x_flat = x_p.reshape(n_pad, c, hp * wp)
    x_flat = jnp.pad(x_flat, ((0, 0), (0, 0), (0, l_in - hp * wp)))
    x_flat = x_flat.astype(jnp.bfloat16)

    # ---- weights: (Cout,Cin,KH,KW) -> (Cout, KH*KW*Cin), tap-major columns ----
    w2d = jnp.transpose(weight, (0, 2, 3, 1)).reshape(c_out, ksize * ksize * c)
    w2d = w2d.astype(jnp.bfloat16)
    b2d = bias.reshape(c_out, 1).astype(jnp.float32)

    # ---- Pallas hot path: NCHW-ordered in, NC(H*Wp)-ordered out --------------
    out_flat = conv_bias_relu(x_flat, w2d, b2d, wp=wp, ksize=ksize,
                              m_pad=m_pad, mt=mt, b_imgs=b_imgs)

    # ---- epilogue: one strided slice back to NCHW (no transpose) -------------
    # NOTE: columns beyond W of each row are junk and discarded here only.
    out = out_flat[:n, :, :m_valid].reshape(n, c_out, h, wp)[:, :, :, :w]
    return out


# ----------------------------------------------------------------------------
# Synthetic "engine": conv3x3 + bias + ReLU, parameters built in-script
# ----------------------------------------------------------------------------
class SyntheticEngine:
    """Stands in for trt.ICudaEngine: fixed graph + per-input shape profiles."""

    def __init__(self, key, c_in=4, c_out=8, ksize=3):
        kw_, kb = jax.random.split(key)
        self.c_in, self.c_out, self.ksize = c_in, c_out, ksize
        # deterministic weights, PyTorch conv layout (Cout, Cin, KH, KW)
        self.weight = jax.random.normal(
            kw_, (c_out, c_in, ksize, ksize), jnp.float32) * 0.1
        self.bias = jax.random.normal(kb, (c_out,), jnp.float32) * 0.1
        # (min, opt, max) shape profile for the single input tensor
        self.profiles = {
            "input": ((1, c_in, 8, 8), (2, c_in, 16, 16), (8, c_in, 64, 64)),
        }

    def get_tensor_profile_shape(self, name, profile_id):
        return self.profiles[name]


class TRTWrapper:
    """JAX/Pallas analogue of the TensorRT TRTWrapper module.

    Dict-in/dict-out forward contract and shape-profile validation reproduced
    faithfully; the engine body runs through the Pallas kernel.
    """

    def __init__(self, engine: SyntheticEngine,
                 input_names: Sequence[str],
                 output_names: Sequence[str]):
        if not isinstance(engine, SyntheticEngine):
            raise TypeError("`engine` should be a SyntheticEngine, "
                            f"but given: {type(engine)}")
        self.engine = engine
        self._input_names = list(input_names)
        self._output_names = list(output_names)
        # TODO(synk): engine deserialization / create_execution_context() /
        # set_tensor_address / execute_async_v3 are raw-pointer TensorRT
        # mechanics with no Pallas equivalent.

    def _trt_execute(self, x_nchw: jnp.ndarray) -> jnp.ndarray:
        eng = self.engine
        return _run_engine(x_nchw, eng.weight, eng.bias, ksize=eng.ksize)

    def forward(self,
                inputs: Dict[str, jnp.ndarray],
                outputs: Optional[Dict[str, jnp.ndarray]] = None
                ) -> Dict[str, jnp.ndarray]:
        profile_id = 0
        for input_name, input_tensor in inputs.items():
            profile = self.engine.get_tensor_profile_shape(input_name,
                                                           profile_id)
            assert input_tensor.ndim == len(profile[0]), \
                "Input dim is different from engine profile."
            for s_min, s_input, s_max in zip(profile[0], input_tensor.shape,
                                             profile[2]):
                assert s_min <= s_input <= s_max, (
                    f"Input shape of {input_name} should be between "
                    f"{profile[0]} and {profile[2]} but get "
                    f"{tuple(input_tensor.shape)}.")

        if outputs is None:
            outputs = {}

        result = self._trt_execute(inputs[self._input_names[0]])
        for output_name in self._output_names:
            outputs[output_name] = result
        return outputs

    __call__ = forward


# ----------------------------------------------------------------------------
if __name__ == "__main__":
    key = jax.random.PRNGKey(0)
    k_eng, k_in = jax.random.split(key)

    engine = SyntheticEngine(k_eng, c_in=4, c_out=8, ksize=3)
    model = TRTWrapper(engine, input_names=["input"], output_names=["output"])

    x = jax.random.normal(k_in, (2, 4, 16, 16), jnp.float32)   # NCHW
    outs = model({"input": x}, None)
    y = jax.block_until_ready(outs["output"])
    assert y.shape == (2, 8, 16, 16)

    # Reference A: conv of the same bf16-quantized operands, f32 math
    # (validates the kernel arithmetic tightly).
    xq = x.astype(jnp.bfloat16).astype(jnp.float32)
    wq = engine.weight.astype(jnp.bfloat16).astype(jnp.float32)
    ref_q = jax.lax.conv_general_dilated(
        xq, wq, window_strides=(1, 1), padding="SAME",
        dimension_numbers=("NCHW", "OIHW", "NCHW"))
    ref_q = jnp.maximum(ref_q + engine.bias[None, :, None, None], 0.0)
    assert jnp.allclose(y, ref_q, rtol=1e-3, atol=1e-3), \
        float(jnp.max(jnp.abs(y - ref_q)))

    # Reference B: full-f32 conv, loose tolerance (bf16 MXU inputs).
    ref_f = jax.lax.conv_general_dilated(
        x, engine.weight, window_strides=(1, 1), padding="SAME",
        dimension_numbers=("NCHW", "OIHW", "NCHW"))
    ref_f = jnp.maximum(ref_f + engine.bias[None, :, None, None], 0.0)
    assert jnp.allclose(y, ref_f, rtol=5e-2, atol=5e-2), \
        float(jnp.max(jnp.abs(y - ref_f)))

    print("KERNEL_OK")
</pallas_src>

<mosaic_0001>
module attributes {stable_mosaic.version = 11 : i64} {
  func.func @_conv_kernel(%arg0: i32, %arg1: memref<2x4x422xbf16, #tpu.memory_space<vmem>>, %arg2: memref<8x36xbf16, #tpu.memory_space<vmem>>, %arg3: memref<8x1xf32, #tpu.memory_space<vmem>>, %arg4: memref<2x8x384xf32, #tpu.memory_space<vmem>>, %arg5: memref<36x384xbf16, #tpu.memory_space<vmem>>) attributes {dimension_semantics = [#tpu.dimension_semantics<parallel>], iteration_bounds = array<i64: 1>, scalar_prefetch = 0 : i64, scratch_operands = 1 : i64, tpu.core_type = #tpu.core_type<tc>, window_params = [{transform_indices = @transform_0, window_bounds = array<i64: 2, 4, 422>}, {pipeline_mode = #tpu.pipeline_mode<synchronous>, transform_indices = @transform_1, window_bounds = array<i64: 8, 36>}, {pipeline_mode = #tpu.pipeline_mode<synchronous>, transform_indices = @transform_2, window_bounds = array<i64: 8, 1>}, {transform_indices = @transform_3, window_bounds = array<i64: 2, 8, 384>}]} {
    %c0 = arith.constant 0 : index
    %c0_0 = arith.constant 0 : index
    %0 = vector.load %arg2[%c0, %c0_0] : memref<8x36xbf16, #tpu.memory_space<vmem>>, vector<8x36xbf16>
    %c0_1 = arith.constant 0 : index
    %c0_2 = arith.constant 0 : index
    %1 = vector.load %arg3[%c0_1, %c0_2] : memref<8x1xf32, #tpu.memory_space<vmem>>, vector<8x1xf32>
    %2 = vector.shape_cast %1 : vector<8x1xf32> to vector<8x1xf32>
    %3 = vector.broadcast %2 : vector<8x1xf32> to vector<8x384xf32>
    %c0_3 = arith.constant 0 : index
    %c0_4 = arith.constant 0 : index
    %c0_5 = arith.constant 0 : index
    %4 = vector.load %arg1[%c0_3, %c0_4, %c0_5] : memref<2x4x422xbf16, #tpu.memory_space<vmem>>, vector<1x4x384xbf16>
    %5 = vector.shape_cast %4 : vector<1x4x384xbf16> to vector<4x384xbf16>
    %c0_6 = arith.constant 0 : index
    %c0_7 = arith.constant 0 : index
    %6 = vector.load %arg5[%c0_6, %c0_7] : memref<36x384xbf16, #tpu.memory_space<vmem>>, vector<4x384xbf16>
    tpu.vector_store %arg5[%c0_6, %c0_7], %5 {strides = array<i32>} : memref<36x384xbf16, #tpu.memory_space<vmem>>, vector<4x384xbf16>,
    %c0_8 = arith.constant 0 : index
    %c0_9 = arith.constant 0 : index
    %c1 = arith.constant 1 : index
    %7 = vector.load %arg1[%c0_8, %c0_9, %c1] : memref<2x4x422xbf16, #tpu.memory_space<vmem>>, vector<1x4x384xbf16>
    %8 = vector.shape_cast %7 : vector<1x4x384xbf16> to vector<4x384xbf16>
    %c4 = arith.constant 4 : index
    %c0_10 = arith.constant 0 : index
    %9 = vector.load %arg5[%c4, %c0_10] : memref<36x384xbf16, #tpu.memory_space<vmem>>, vector<4x384xbf16>
    tpu.vector_store %arg5[%c4, %c0_10], %8 {strides = array<i32>} : memref<36x384xbf16, #tpu.memory_space<vmem>>, vector<4x384xbf16>,
    %c0_11 = arith.constant 0 : index
    %c0_12 = arith.constant 0 : index
    %c2 = arith.constant 2 : index
    %10 = vector.load %arg1[%c0_11, %c0_12, %c2] : memref<2x4x422xbf16, #tpu.memory_space<vmem>>, vector<1x4x384xbf16>
    %11 = vector.shape_cast %10 : vector<1x4x384xbf16> to vector<4x384xbf16>
    %c8 = arith.constant 8 : index
    %c0_13 = arith.constant 0 : index
    %12 = vector.load %arg5[%c8, %c0_13] : memref<36x384xbf16, #tpu.memory_space<vmem>>, vector<4x384xbf16>
    tpu.vector_store %arg5[%c8, %c0_13], %11 {strides = array<i32>} : memref<36x384xbf16, #tpu.memory_space<vmem>>, vector<4x384xbf16>,
    %c0_14 = arith.constant 0 : index
    %c0_15 = arith.constant 0 : index
    %c18 = arith.constant 18 : index
    %13 = vector.load %arg1[%c0_14, %c0_15, %c18] : memref<2x4x422xbf16, #tpu.memory_space<vmem>>, vector<1x4x384xbf16>
    %14 = vector.shape_cast %13 : vector<1x4x384xbf16> to vector<4x384xbf16>
    %c12 = arith.constant 12 : index
    %c0_16 = arith.constant 0 : index
    %15 = vector.load %arg5[%c12, %c0_16] : memref<36x384xbf16, #tpu.memory_space<vmem>>, vector<4x384xbf16>
    tpu.vector_store %arg5[%c12, %c0_16], %14 {strides = array<i32>} : memref<36x384xbf16, #tpu.memory_space<vmem>>, vector<4x384xbf16>,
    %c0_17 = arith.constant 0 : index
    %c0_18 = arith.constant 0 : index
    %c19 = arith.constant 19 : index
    %16 = vector.load %arg1[%c0_17, %c0_18, %c19] : memref<2x4x422xbf16, #tpu.memory_space<vmem>>, vector<1x4x384xbf16>
    %17 = vector.shape_cast %16 : vector<1x4x384xbf16> to vector<4x384xbf16>
    %c16 = arith.constant 16 : index
    %c0_19 = arith.constant 0 : index
    %18 = vector.load %arg5[%c16, %c0_19] : memref<36x384xbf16, #tpu.memory_space<vmem>>, vector<4x384xbf16>
    tpu.vector_store %arg5[%c16, %c0_19], %17 {strides = array<i32>} : memref<36x384xbf16, #tpu.memory_space<vmem>>, vector<4x384xbf16>,
    %c0_20 = arith.constant 0 : index
    %c0_21 = arith.constant 0 : index
    %c20 = arith.constant 20 : index
    %19 = vector.load %arg1[%c0_20, %c0_21, %c20] : memref<2x4x422xbf16, #tpu.memory_space<vmem>>, vector<1x4x384xbf16>
    %20 = vector.shape_cast %19 : vector<1x4x384xbf16> to vector<4x384xbf16>
    %c20_22 = arith.constant 20 : index
    %c0_23 = arith.constant 0 : index
    %21 = vector.load %arg5[%c20_22, %c0_23] : memref<36x384xbf16, #tpu.memory_space<vmem>>, vector<4x384xbf16>
    tpu.vector_store %arg5[%c20_22, %c0_23], %20 {strides = array<i32>} : memref<36x384xbf16, #tpu.memory_space<vmem>>, vector<4x384xbf16>,
    %c0_24 = arith.constant 0 : index
    %c0_25 = arith.constant 0 : index
    %c36 = arith.constant 36 : index
    %22 = vector.load %arg1[%c0_24, %c0_25, %c36] : memref<2x4x422xbf16, #tpu.memory_space<vmem>>, vector<1x4x384xbf16>
    %23 = vector.shape_cast %22 : vector<1x4x384xbf16> to vector<4x384xbf16>
    %c24 = arith.constant 24 : index
    %c0_26 = arith.constant 0 : index
    %24 = vector.load %arg5[%c24, %c0_26] : memref<36x384xbf16, #tpu.memory_space<vmem>>, vector<4x384xbf16>
    tpu.vector_store %arg5[%c24, %c0_26], %23 {strides = array<i32>} : memref<36x384xbf16, #tpu.memory_space<vmem>>, vector<4x384xbf16>,
    %c0_27 = arith.constant 0 : index
    %c0_28 = arith.constant 0 : index
    %c37 = arith.constant 37 : index
    %25 = vector.load %arg1[%c0_27, %c0_28, %c37] : memref<2x4x422xbf16, #tpu.memory_space<vmem>>, vector<1x4x384xbf16>
    %26 = vector.shape_cast %25 : vector<1x4x384xbf16> to vector<4x384xbf16>
    %c28 = arith.constant 28 : index
    %c0_29 = arith.constant 0 : index
    %27 = vector.load %arg5[%c28, %c0_29] : memref<36x384xbf16, #tpu.memory_space<vmem>>, vector<4x384xbf16>
    tpu.vector_store %arg5[%c28, %c0_29], %26 {strides = array<i32>} : memref<36x384xbf16, #tpu.memory_space<vmem>>, vector<4x384xbf16>,
    %c0_30 = arith.constant 0 : index
    %c0_31 = arith.constant 0 : index
    %c38 = arith.constant 38 : index
    %28 = vector.load %arg1[%c0_30, %c0_31, %c38] : memref<2x4x422xbf16, #tpu.memory_space<vmem>>, vector<1x4x384xbf16>
    %29 = vector.shape_cast %28 : vector<1x4x384xbf16> to vector<4x384xbf16>
    %c32 = arith.constant 32 : index
    %c0_32 = arith.constant 0 : index
    %30 = vector.load %arg5[%c32, %c0_32] : memref<36x384xbf16, #tpu.memory_space<vmem>>, vector<4x384xbf16>
    tpu.vector_store %arg5[%c32, %c0_32], %29 {strides = array<i32>} : memref<36x384xbf16, #tpu.memory_space<vmem>>, vector<4x384xbf16>,
    %c0_33 = arith.constant 0 : index
    %c0_34 = arith.constant 0 : index
    %31 = vector.load %arg5[%c0_33, %c0_34] : memref<36x384xbf16, #tpu.memory_space<vmem>>, vector<36x384xbf16>
    %cst = arith.constant dense<0.000000e+00> : vector<8x384xf32>
    %32 = tpu.matmul %0, %31, %cst {dimension_numbers = #tpu.dot_dimension_numbers<[1], [0], [0], [1], [0, 0, 1, 1], [], []>} : vector<8x36xbf16>, vector<36x384xbf16>, vector<8x384xf32> -> vector<8x384xf32>
    %33 = arith.addf %32, %3 : vector<8x384xf32>
    %cst_35 = arith.constant 0.000000e+00 : f32
    %34 = vector.broadcast %cst_35 : f32 to vector<8x384xf32>
    %35 = arith.maximumf %33, %34 : vector<8x384xf32>
    %c0_36 = arith.constant 0 : index
    %c0_37 = arith.constant 0 : index
    %c0_38 = arith.constant 0 : index
    %36 = vector.load %arg4[%c0_36, %c0_37, %c0_38] : memref<2x8x384xf32, #tpu.memory_space<vmem>>, vector<1x8x384xf32>
    %37 = vector.shape_cast %36 : vector<1x8x384xf32> to vector<8x384xf32>
    %38 = vector.shape_cast %35 : vector<8x384xf32> to vector<1x8x384xf32>
    tpu.vector_store %arg4[%c0_36, %c0_37, %c0_38], %38 {strides = array<i32>} : memref<2x8x384xf32, #tpu.memory_space<vmem>>, vector<1x8x384xf32>,
    %c1_39 = arith.constant 1 : index
    %c0_40 = arith.constant 0 : index
    %c0_41 = arith.constant 0 : index
    %39 = vector.load %arg1[%c1_39, %c0_40, %c0_41] : memref<2x4x422xbf16, #tpu.memory_space<vmem>>, vector<1x4x384xbf16>
    %40 = vector.shape_cast %39 : vector<1x4x384xbf16> to vector<4x384xbf16>
    %c0_42 = arith.constant 0 : index
    %c0_43 = arith.constant 0 : index
    %41 = vector.load %arg5[%c0_42, %c0_43] : memref<36x384xbf16, #tpu.memory_space<vmem>>, vector<4x384xbf16>
    tpu.vector_store %arg5[%c0_42, %c0_43], %40 {strides = array<i32>} : memref<36x384xbf16, #tpu.memory_space<vmem>>, vector<4x384xbf16>,
    %c1_44 = arith.constant 1 : index
    %c0_45 = arith.constant 0 : index
    %c1_46 = arith.constant 1 : index
    %42 = vector.load %arg1[%c1_44, %c0_45, %c1_46] : memref<2x4x422xbf16, #tpu.memory_space<vmem>>, vector<1x4x384xbf16>
    %43 = vector.shape_cast %42 : vector<1x4x384xbf16> to vector<4x384xbf16>
    %c4_47 = arith.constant 4 : index
    %c0_48 = arith.constant 0 : index
    %44 = vector.load %arg5[%c4_47, %c0_48] : memref<36x384xbf16, #tpu.memory_space<vmem>>, vector<4x384xbf16>
    tpu.vector_store %arg5[%c4_47, %c0_48], %43 {strides = array<i32>} : memref<36x384xbf16, #tpu.memory_space<vmem>>, vector<4x384xbf16>,
    %c1_49 = arith.constant 1 : index
    %c0_50 = arith.constant 0 : index
    %c2_51 = arith.constant 2 : index
    %45 = vector.load %arg1[%c1_49, %c0_50, %c2_51] : memref<2x4x422xbf16, #tpu.memory_space<vmem>>, vector<1x4x384xbf16>
    %46 = vector.shape_cast %45 : vector<1x4x384xbf16> to vector<4x384xbf16>
    %c8_52 = arith.constant 8 : index
    %c0_53 = arith.constant 0 : index
    %47 = vector.load %arg5[%c8_52, %c0_53] : memref<36x384xbf16, #tpu.memory_space<vmem>>, vector<4x384xbf16>
    tpu.vector_store %arg5[%c8_52, %c0_53], %46 {strides = array<i32>} : memref<36x384xbf16, #tpu.memory_space<vmem>>, vector<4x384xbf16>,
    %c1_54 = arith.constant 1 : index
    %c0_55 = arith.constant 0 : index
    %c18_56 = arith.constant 18 : index
    %48 = vector.load %arg1[%c1_54, %c0_55, %c18_56] : memref<2x4x422xbf16, #tpu.memory_space<vmem>>, vector<1x4x384xbf16>
    %49 = vector.shape_cast %48 : vector<1x4x384xbf16> to vector<4x384xbf16>
    %c12_57 = arith.constant 12 : index
    %c0_58 = arith.constant 0 : index
    %50 = vector.load %arg5[%c12_57, %c0_58] : memref<36x384xbf16, #tpu.memory_space<vmem>>, vector<4x384xbf16>
    tpu.vector_store %arg5[%c12_57, %c0_58], %49 {strides = array<i32>} : memref<36x384xbf16, #tpu.memory_space<vmem>>, vector<4x384xbf16>,
    %c1_59 = arith.constant 1 : index
    %c0_60 = arith.constant 0 : index
    %c19_61 = arith.constant 19 : index
    %51 = vector.load %arg1[%c1_59, %c0_60, %c19_61] : memref<2x4x422xbf16, #tpu.memory_space<vmem>>, vector<1x4x384xbf16>
    %52 = vector.shape_cast %51 : vector<1x4x384xbf16> to vector<4x384xbf16>
    %c16_62 = arith.constant 16 : index
    %c0_63 = arith.constant 0 : index
    %53 = vector.load %arg5[%c16_62, %c0_63] : memref<36x384xbf16, #tpu.memory_space<vmem>>, vector<4x384xbf16>
    tpu.vector_store %arg5[%c16_62, %c0_63], %52 {strides = array<i32>} : memref<36x384xbf16, #tpu.memory_space<vmem>>, vector<4x384xbf16>,
    %c1_64 = arith.constant 1 : index
    %c0_65 = arith.constant 0 : index
    %c20_66 = arith.constant 20 : index
    %54 = vector.load %arg1[%c1_64, %c0_65, %c20_66] : memref<2x4x422xbf16, #tpu.memory_space<vmem>>, vector<1x4x384xbf16>
    %55 = vector.shape_cast %54 : vector<1x4x384xbf16> to vector<4x384xbf16>
    %c20_67 = arith.constant 20 : index
    %c0_68 = arith.constant 0 : index
    %56 = vector.load %arg5[%c20_67, %c0_68] : memref<36x384xbf16, #tpu.memory_space<vmem>>, vector<4x384xbf16>
    tpu.vector_store %arg5[%c20_67, %c0_68], %55 {strides = array<i32>} : memref<36x384xbf16, #tpu.memory_space<vmem>>, vector<4x384xbf16>,
    %c1_69 = arith.constant 1 : index
    %c0_70 = arith.constant 0 : index
    %c36_71 = arith.constant 36 : index
    %57 = vector.load %arg1[%c1_69, %c0_70, %c36_71] : memref<2x4x422xbf16, #tpu.memory_space<vmem>>, vector<1x4x384xbf16>
    %58 = vector.shape_cast %57 : vector<1x4x384xbf16> to vector<4x384xbf16>
    %c24_72 = arith.constant 24 : index
    %c0_73 = arith.constant 0 : index
    %59 = vector.load %arg5[%c24_72, %c0_73] : memref<36x384xbf16, #tpu.memory_space<vmem>>, vector<4x384xbf16>
    tpu.vector_store %arg5[%c24_72, %c0_73], %58 {strides = array<i32>} : memref<36x384xbf16, #tpu.memory_space<vmem>>, vector<4x384xbf16>,
    %c1_74 = arith.constant 1 : index
    %c0_75 = arith.constant 0 : index
    %c37_76 = arith.constant 37 : index
    %60 = vector.load %arg1[%c1_74, %c0_75, %c37_76] : memref<2x4x422xbf16, #tpu.memory_space<vmem>>, vector<1x4x384xbf16>
    %61 = vector.shape_cast %60 : vector<1x4x384xbf16> to vector<4x384xbf16>
    %c28_77 = arith.constant 28 : index
    %c0_78 = arith.constant 0 : index
    %62 = vector.load %arg5[%c28_77, %c0_78] : memref<36x384xbf16, #tpu.memory_space<vmem>>, vector<4x384xbf16>
    tpu.vector_store %arg5[%c28_77, %c0_78], %61 {strides = array<i32>} : memref<36x384xbf16, #tpu.memory_space<vmem>>, vector<4x384xbf16>,
    %c1_79 = arith.constant 1 : index
    %c0_80 = arith.constant 0 : index
    %c38_81 = arith.constant 38 : index
    %63 = vector.load %arg1[%c1_79, %c0_80, %c38_81] : memref<2x4x422xbf16, #tpu.memory_space<vmem>>, vector<1x4x384xbf16>
    %64 = vector.shape_cast %63 : vector<1x4x384xbf16> to vector<4x384xbf16>
    %c32_82 = arith.constant 32 : index
    %c0_83 = arith.constant 0 : index
    %65 = vector.load %arg5[%c32_82, %c0_83] : memref<36x384xbf16, #tpu.memory_space<vmem>>, vector<4x384xbf16>
    tpu.vector_store %arg5[%c32_82, %c0_83], %64 {strides = array<i32>} : memref<36x384xbf16, #tpu.memory_space<vmem>>, vector<4x384xbf16>,
    %c0_84 = arith.constant 0 : index
    %c0_85 = arith.constant 0 : index
    %66 = vector.load %arg5[%c0_84, %c0_85] : memref<36x384xbf16, #tpu.memory_space<vmem>>, vector<36x384xbf16>
    %cst_86 = arith.constant dense<0.000000e+00> : vector<8x384xf32>
    %67 = tpu.matmul %0, %66, %cst_86 {dimension_numbers = #tpu.dot_dimension_numbers<[1], [0], [0], [1], [0, 0, 1, 1], [], []>} : vector<8x36xbf16>, vector<36x384xbf16>, vector<8x384xf32> -> vector<8x384xf32>
    %68 = arith.addf %67, %3 : vector<8x384xf32>
    %cst_87 = arith.constant 0.000000e+00 : f32
    %69 = vector.broadcast %cst_87 : f32 to vector<8x384xf32>
    %70 = arith.maximumf %68, %69 : vector<8x384xf32>
    %c1_88 = arith.constant 1 : index
    %c0_89 = arith.constant 0 : index
    %c0_90 = arith.constant 0 : index
    %71 = vector.load %arg4[%c1_88, %c0_89, %c0_90] : memref<2x8x384xf32, #tpu.memory_space<vmem>>, vector<1x8x384xf32>
    %72 = vector.shape_cast %71 : vector<1x8x384xf32> to vector<8x384xf32>
    %73 = vector.shape_cast %70 : vector<8x384xf32> to vector<1x8x384xf32>
    tpu.vector_store %arg4[%c1_88, %c0_89, %c0_90], %73 {strides = array<i32>} : memref<2x8x384xf32, #tpu.memory_space<vmem>>, vector<1x8x384xf32>,
    return
  }
  func.func @transform_0(%arg0: i32) -> (i32, i32, i32) {
    %c0_i32 = arith.constant 0 : i32
    %c0_i32_0 = arith.constant 0 : i32
    %c0_i32_1 = arith.constant 0 : i32
    return %arg0, %c0_i32, %c0_i32_0 : i32, i32, i32
  }
  func.func @transform_1(%arg0: i32) -> (i32, i32) {
    %c0_i32 = arith.constant 0 : i32
    %c0_i32_0 = arith.constant 0 : i32
    %c0_i32_1 = arith.constant 0 : i32
    return %c0_i32, %c0_i32_0 : i32, i32
  }
  func.func @transform_2(%arg0: i32) -> (i32, i32) {
    %c0_i32 = arith.constant 0 : i32
    %c0_i32_0 = arith.constant 0 : i32
    %c0_i32_1 = arith.constant 0 : i32
    return %c0_i32, %c0_i32_0 : i32, i32
  }
  func.func @transform_3(%arg0: i32) -> (i32, i32, i32) {
    %c0_i32 = arith.constant 0 : i32
    %c0_i32_0 = arith.constant 0 : i32
    %c0_i32_1 = arith.constant 0 : i32
    return %arg0, %c0_i32, %c0_i32_0 : i32, i32, i32
  }
}

</mosaic_0001>

<bundles_post_ra>
// kernel: _run_engine.1
= control target key start
LH: loop header
LB: loop body
LE: loop exit
PB: predicated region body
PF: predicated region fallthrough
CT: control target
= control target key end

     0   :  { %v49_v0 = vlaneseq  ;;  %v964_v1 = vmov 1983009808   ;;  %s965_s16 = smov 126   ;;  %s966_s17 = smov 127   ;;  %v967_v14 = vmov 0.0   ;;  %vm974_vm0 = vmmov 0   ;;  %s1133_s0 = inlined_call_operand.vmem [shape: bf16[2,4,422], index: 0, kind: input, shape index: {}]   ;;  %s1134_s2 = inlined_call_operand.vmem [shape: f32[8,1], index: 2, kind: input, shape index: {}]   ;;  %s1135_s1 = inlined_call_operand.vmem [shape: bf16[8,36], index: 1, kind: input, shape index: {}]   ;;  %s1136_s3 = inlined_call_operand.vmem [shape: f32[2,8,384], index: 3, kind: output, shape index: {}]  }
   0x1   :  { %v47_v2 = vunpack.c.l.s4 %v964_v1  ;;  %v75_v3 = vld [vmem:[%s1133_s0] sm:$0xff]  ;;  %904 = vmatprep.subr.bf16.mxu1 %v967_v14  ;;  %s968_s18 = smov 110   ;;  %s969_s19 = smov 109   ;;  %v873_v15 = vld [vmem:[%s1133_s0 + $0x8] sm:$0xff]  ;;  %910 = vmatprep.mubr.msk.bf16.mxu1 %vm974_vm0, %v967_v14  ;;  %v975_v21 = vmov 0   ;;  %vm66_vm1 = vcmask 1043456  }
   0x2   :  { %v50_v4 = vshrl.u32 %v49_v0, 7  ;;  %v22_v5 = vld [vmem:[%s1133_s0] sm:$0x3f]  ;;  %v45_v7 = vcombine.low %v75_v3, %v75_v3  ;;  %v77_v10 = vcombine.high %v75_v3, %v75_v3  ;;  %s970_s20 = smov 108   ;;  %s971_s21 = smov 92   ;;  %v467_v16 = vcombine.low %v873_v15, %v873_v15  ;;  %388 = vmatprep.mubr.bf16.mxu0 %v975_v21  ;;  %936 = vset.pattern.permute.xlu0 %v975_v21 }
   0x3   :  { %v48_v6 = vunpack.c.0.s8 %v47_v2  ;;  %v24_v8 = vcombine.high %v22_v5, %v22_v5  ;;  %856 = vst.sshfl [vmem:[#allocation2] sm:$0xf pattern:$0x76325410] %v22_v5  ;;  %s972_s24 = smov 91   ;;  %s973_s25 = smov 90   ;;  %v497_v19 = vcombine.high %v873_v15, %v873_v15 }
   0x4   :  { %v16_v22 = vld [vmem:[%s1134_s2] sm:$0xff]  ;;  %vm99_vm2 = vcmask 1031168   ;;  %vm68_vm3 = vcmask 1039360   ;;  %vm130_vm4 = vcmask 900096   ;;  %vm161_vm5 = vcmask 891904  }
   0x5   :  { %v51_v9 = vsub.s32 %v48_v6, %v50_v4  ;;  %857 = vst.sshfl [vmem:[#allocation2 + $0x8] sm:$0x3 pattern:$0x76325410] %v24_v8  ;;  %v870_v48 = vld [vmem:[%s1133_s0 + $0x8] sm:$0x3f] }
   0x6   :  { %vm192_vm6 = vcmask 883712   ;;  %v446_v54 = vcombine.high %v870_v48, %v870_v48  ;;  %vm223_vm7 = vcmask 752640   ;;  %vm254_vm8 = vcmask 744448  }
   0x7   :  { %v84_v11 = vrot.slane %v75_v3, %v51_v9  ;;  %v52_v12 = vrot.slane %v45_v7, %v51_v9  ;;  %v91_v13 = vrot.slane %v77_v10, %v51_v9  ;;  %v481_v17 = vrot.slane %v873_v15, %v51_v9 }
   0x8   :  { %v474_v18 = vrot.slane %v467_v16, %v51_v9  ;;  %v511_v20 = vrot.slane %v497_v19, %v51_v9  ;;  %vm285_vm9 = vcmask 736256   ;;  %vm346_vm10 = vcmask 1041408  }
   0x9   :  { %92 = vrot.lane.b32.xlu1 %v84_v11, %s965_s16  ;;  %60 = vrot.lane.b32.xlu0 %v52_v12, %s966_s17  ;;  %vm342_vm11 = vcmask 293888  }
   0xd   :  { %94 = vrot.lane.b32.xlu1 %v91_v13, %s965_s16  ;;  %62 = vrot.lane.b32.xlu0 %v84_v11, %s966_s17 }
  0x11   :  { %125 = vrot.lane.b32.xlu1 %v84_v11, %s968_s18  ;;  %123 = vrot.lane.b32.xlu0 %v52_v12, %s968_s18 }
  0x15   :  { %156 = vrot.lane.b32.xlu1 %v91_v13, %s969_s19  ;;  %154 = vrot.lane.b32.xlu0 %v84_v11, %s969_s19 }
  0x19   :  { %187 = vrot.lane.b32.xlu1 %v84_v11, %s970_s20  ;;  %185 = vrot.lane.b32.xlu0 %v52_v12, %s970_s20 }
  0x1d   :  { %218 = vrot.lane.b32.xlu1 %v91_v13, %s971_s21  ;;  %216 = vrot.lane.b32.xlu0 %v84_v11, %s971_s21 }
  0x21   :  { %249 = vrot.lane.b32.xlu1 %v84_v11, %s972_s24  ;;  %247 = vrot.lane.b32.xlu0 %v52_v12, %s972_s24 }
  0x25   :  { %280 = vrot.lane.b32.xlu1 %v91_v13, %s973_s25  ;;  %278 = vrot.lane.b32.xlu0 %v84_v11, %s973_s25 }
  0x29   :  { %484 = vrot.lane.b32.xlu1 %v481_v17, %s966_s17  ;;  %482 = vrot.lane.b32.xlu0 %v474_v18, %s966_s17 }
  0x2d   :  { %514 = vrot.lane.b32.xlu1 %v511_v20, %s965_s16  ;;  %512 = vrot.lane.b32.xlu0 %v481_v17, %s965_s16 }
  0x31   :  { %544 = vrot.lane.b32.xlu1 %v481_v17, %s968_s18  ;;  %542 = vrot.lane.b32.xlu0 %v474_v18, %s968_s18 }
  0x35   :  { %574 = vrot.lane.b32.xlu1 %v511_v20, %s969_s19  ;;  %572 = vrot.lane.b32.xlu0 %v481_v17, %s969_s19 }
  0x39   :  { %604 = vrot.lane.b32.xlu1 %v481_v17, %s970_s20  ;;  %602 = vrot.lane.b32.xlu0 %v474_v18, %s970_s20 }
  0x3d   :  { %634 = vrot.lane.b32.xlu1 %v511_v20, %s971_s21  ;;  %632 = vrot.lane.b32.xlu0 %v481_v17, %s971_s21 }
  0x41   :  { %664 = vrot.lane.b32.xlu1 %v481_v17, %s972_s24  ;;  %662 = vrot.lane.b32.xlu0 %v474_v18, %s972_s24 }
  0x45   :  { %694 = vrot.lane.b32.xlu1 %v511_v20, %s973_s25  ;;  %692 = vrot.lane.b32.xlu0 %v481_v17, %s973_s25 }
  0x49   :  { %19 = vperm.xlu0 %936, %v16_v22  }
  0x7b   :  { %v93_v23 = vpop.permute.xlu1 %92  ;;  %v61_v24 = vpop.permute.xlu0 %60 }
  0x7c   :  { %v96_v27 = vrot.slane %v93_v23, 4  ;;  %v64_v28 = vrot.slane %v61_v24, 4 }
  0x7f   :  { %v95_v25 = vpop.permute.xlu1 %94  ;;  %v63_v26 = vpop.permute.xlu0 %62 }
  0x80   :  { %v97_v29 = vrot.slane %v95_v25, 4  ;;  %v65_v30 = vrot.slane %v63_v26, 4 }
  0x82   :  { %v98_v31 = vsel %vm66_vm1, %v96_v27, %v97_v29  ;;  %v101_v32 = vsel %vm99_vm2, %v95_v25, %v97_v29  ;;  %v67_v33 = vsel %vm66_vm1, %v64_v28, %v65_v30  ;;  %v70_v34 = vsel %vm68_vm3, %v63_v26, %v65_v30 }
  0x83   :  { %v100_v35 = vsel %vm99_vm2, %v93_v23, %v98_v31  ;;  %105 = vst [vmem:[#allocation2 + $0x14] sm:$0x3] %v101_v32  ;;  %v69_v36 = vsel %vm68_vm3, %v61_v24, %v67_v33  ;;  %74 = vst [vmem:[#allocation2 + $0x8] sm:$0xc] %v70_v34  ;;  %v126_v37 = vpop.permute.xlu1 %125  ;;  %v124_v38 = vpop.permute.xlu0 %123 }
  0x84   :  { %104 = vst [vmem:[#allocation2 + $0xc] sm:$0x33] %v100_v35  ;;  %73 = vst [vmem:[#allocation2] sm:$0xcc] %v69_v36  ;;  %v128_v39 = vrot.slane %v126_v37, 4  ;;  %v127_v40 = vrot.slane %v124_v38, 4 }
  0x86   :  { %v132_v41 = vsel %vm130_vm4, %v126_v37, %v128_v39  ;;  %v129_v42 = vsel %vm66_vm1, %v127_v40, %v128_v39 }
  0x87   :  { %136 = vst [vmem:[#allocation2 + $0x14] sm:$0xc] %v132_v41  ;;  %v131_v43 = vsel %vm130_vm4, %v124_v38, %v129_v42  ;;  %v157_v44 = vpop.permute.xlu1 %156  ;;  %v155_v45 = vpop.permute.xlu0 %154 }
  0x88   :  { %135 = vst [vmem:[#allocation2 + $0xc] sm:$0xcc] %v131_v43  ;;  %v159_v46 = vrot.slane %v157_v44, 4  ;;  %v158_v47 = vrot.slane %v155_v45, 4 }
  0x8a   :  { %v163_v49 = vsel %vm161_vm5, %v157_v44, %v159_v46  ;;  %v160_v50 = vsel %vm66_vm1, %v158_v47, %v159_v46 }
  0x8b   :  { %167 = vst [vmem:[#allocation2 + $0x20] sm:$0x3] %v163_v49  ;;  %v162_v51 = vsel %vm161_vm5, %v155_v45, %v160_v50  ;;  %v188_v52 = vpop.permute.xlu1 %187  ;;  %v186_v53 = vpop.permute.xlu0 %185  ;;  %v292_v63 = vld [vmem:[#allocation2] sm:$0xff] }
  0x8c   :  { %166 = vst [vmem:[#allocation2 + $0x18] sm:$0x33] %v162_v51  ;;  %v190_v55 = vrot.slane %v188_v52, 4  ;;  %v189_v56 = vrot.slane %v186_v53, 4  ;;  %v1076_v50 = vld [vmem:[%s1135_s1] sm:$0xf] }
  0x8e   :  { %v194_v57 = vsel %vm192_vm6, %v188_v52, %v190_v55  ;;  %v191_v58 = vsel %vm66_vm1, %v189_v56, %v190_v55  ;;  %v942_v59 = vld [vmem:[#allocation2 + $0x8] ss:$12 sps:$4 sm:$0xff]  }
  0x8f   :  { %198 = vst [vmem:[#allocation2 + $0x20] sm:$0xc] %v194_v57  ;;  %v193_v60 = vsel %vm192_vm6, %v186_v53, %v191_v58  ;;  %v219_v61 = vpop.permute.xlu1 %218  ;;  %v217_v62 = vpop.permute.xlu0 %216  ;;  %872 = vst.sshfl [vmem:[#allocation2 + $0x8] sm:$0x3 pattern:$0x76325410] %v446_v54  ;;  %905 = vmatpush3.bf16.msra.mxu1 %v942_v59 }
  0x90   :  { %v294_v0 = vld [vmem:[#allocation2 + $0xc] sm:$0xff]  ;;  %197 = vst [vmem:[#allocation2 + $0x18] sm:$0xcc] %v193_v60  ;;  %v221_v2 = vrot.slane %v219_v61, 4  ;;  %v220_v3 = vrot.slane %v217_v62, 4  ;;  %906 = vmatprep.subr.bf16.mxu1 %v967_v14 }
  0x91   :  { %v944_v1 = vld [vmem:[#allocation2 + $0x4] ss:$12 sps:$4 sm:$0xff]   ;;  %v858_v4 = vcombine.low %v292_v63, %v294_v0 }
  0x92   :  { %871 = vst.sshfl [vmem:[#allocation2] sm:$0xf pattern:$0x76325410] %v870_v48  ;;  %356 = vmatprep.subr.bf16.mxu0 %v944_v1  ;;  %v225_v5 = vsel %vm223_vm7, %v219_v61, %v221_v2  ;;  %v222_v6 = vsel %vm66_vm1, %v220_v3, %v221_v2 }
  0x93   :  { %357 = vmatpush1.bf16.msra.mxu0 %v858_v4  ;;  %229 = vst [vmem:[#allocation2 + $0x2c] sm:$0x3] %v225_v5  ;;  %v224_v7 = vsel %vm223_vm7, %v217_v62, %v222_v6  ;;  %v250_v8 = vpop.permute.xlu1 %249  ;;  %v248_v9 = vpop.permute.xlu0 %247 }
  0x94   :  { %228 = vst [vmem:[#allocation2 + $0x24] sm:$0x33] %v224_v7  ;;  %v252_v10 = vrot.slane %v250_v8, 4  ;;  %v251_v11 = vrot.slane %v248_v9, 4 }
  0x96   :  { %v256_v12 = vsel %vm254_vm8, %v250_v8, %v252_v10  ;;  %v253_v13 = vsel %vm66_vm1, %v251_v11, %v252_v10 }
  0x97   :  { %260 = vst [vmem:[#allocation2 + $0x2c] sm:$0xc] %v256_v12  ;;  %v255_v15 = vsel %vm254_vm8, %v248_v9, %v253_v13  ;;  %v281_v16 = vpop.permute.xlu1 %280  ;;  %v279_v17 = vpop.permute.xlu0 %278 }
  0x98   :  { %259 = vst [vmem:[#allocation2 + $0x24] sm:$0xcc] %v255_v15  ;;  %v283_v18 = vrot.slane %v281_v16, 4  ;;  %v282_v19 = vrot.slane %v279_v17, 4 }
  0x9a   :  { %v287_v20 = vsel %vm285_vm9, %v281_v16, %v283_v18  ;;  %v284_v22 = vsel %vm66_vm1, %v282_v19, %v283_v18 }
  0x9b   :  { %291 = vst [vmem:[#allocation2 + $0x38] sm:$0x3] %v287_v20  ;;  %v286_v23 = vsel %vm285_vm9, %v279_v17, %v284_v22  ;;  %v485_v24 = vpop.permute.xlu1 %484  ;;  %v483_v25 = vpop.permute.xlu0 %482 }
  0x9c   :  { %290 = vst [vmem:[#allocation2 + $0x30] sm:$0x33] %v286_v23  ;;  %v487_v26 = vrot.slane %v485_v24, 4  ;;  %v486_v27 = vrot.slane %v483_v25, 4 }
  0x9e   :  { %v490_v28 = vsel %vm68_vm3, %v485_v24, %v487_v26  ;;  %v488_v29 = vsel %vm66_vm1, %v486_v27, %v487_v26  ;;  %v946_v30 = vld [vmem:[#allocation2 + $0x20] ss:$12 sps:$4 sm:$0xff]  }
  0x9f   :  { %494 = vst [vmem:[#allocation2 + $0x8] sm:$0xc] %v490_v28  ;;  %v489_v31 = vsel %vm68_vm3, %v483_v25, %v488_v29  ;;  %v515_v32 = vpop.permute.xlu1 %514  ;;  %v513_v33 = vpop.permute.xlu0 %512  ;;  %v947_v34 = vld [vmem:[#allocation2 + $0x1c] ss:$12 sps:$4 sm:$0xff]   ;;  %v949_v35 = vld [vmem:[#allocation2 + $0x18] ss:$12 sps:$4 sm:$0xff]   ;;  %907 = vmatpush3.bf16.msra.mxu1 %v946_v30 }
  0xa0   :  { %493 = vst [vmem:[#allocation2] sm:$0xcc] %v489_v31  ;;  %v517_v36 = vrot.slane %v515_v32, 4  ;;  %v516_v37 = vrot.slane %v513_v33, 4  ;;  %358 = vmatprep.subr.bf16.mxu0 %v947_v34  ;;  %908 = vmatprep.subr.bf16.mxu1 %v967_v14 }
  0xa1   :  { %359 = vmatpush1.bf16.msra.mxu0 %v949_v35 }
  0xa2   :  { %v520_v38 = vsel %vm99_vm2, %v515_v32, %v517_v36  ;;  %v518_v39 = vsel %vm66_vm1, %v516_v37, %v517_v36  ;;  %v951_v40 = vld [vmem:[#allocation2 + $0x38] ss:$0 sps:$4 sm:$0x33]  }
  0xa3   :  { %524 = vst [vmem:[#allocation2 + $0x14] sm:$0x3] %v520_v38  ;;  %v519_v41 = vsel %vm99_vm2, %v513_v33, %v518_v39  ;;  %v545_v42 = vpop.permute.xlu1 %544  ;;  %v543_v43 = vpop.permute.xlu0 %542  ;;  %v300_v44 = vld [vmem:[#allocation2 + $0x30] sm:$0x33]  ;;  %v354_v48 = vsel %vm346_vm10, %v951_v40, 0 }
  0xa4   :  { %523 = vst [vmem:[#allocation2 + $0xc] sm:$0x33] %v519_v41  ;;  %v547_v45 = vrot.slane %v545_v42, 4  ;;  %v546_v46 = vrot.slane %v543_v43, 4  ;;  %v865_v47 = vcombine.high %v300_v44, %v300_v44  ;;  %909 = vmatpush3.bf16.msra.mxu1 %v354_v48  ;;  %v864_v49 = vcombine.low %v300_v44, %v300_v44 }
  0xa5   :  { %914 = vmatprep.subr.bf16.mxu1 %v967_v14 }
  0xa6   :  { %v550_v51 = vsel %vm130_vm4, %v545_v42, %v547_v45  ;;  %v548_v52 = vsel %vm66_vm1, %v546_v46, %v547_v45  ;;  %867 = vmatprep.subr.msk.bf16.mxu0 %vm346_vm10, %v865_v47  ;;  %v348_v56 = vsel %vm346_vm10, %v864_v49, 0 }
  0xa7   :  { %554 = vst [vmem:[#allocation2 + $0x14] sm:$0xc] %v550_v51  ;;  %v549_v53 = vsel %vm130_vm4, %v543_v43, %v548_v52  ;;  %v575_v54 = vpop.permute.xlu1 %574  ;;  %v573_v55 = vpop.permute.xlu0 %572  ;;  %361 = vmatpush1.bf16.msra.mxu0 %v348_v56  ;;  %911 = vmatmul.mubr.msk.bf16.vlgmr.msra.gmra.mrb[0].mxu1 %vm342_vm11, %v1076_v50 }
  0xa8   :  { %553 = vst [vmem:[#allocation2 + $0xc] sm:$0xcc] %v549_v53  ;;  %v577_v57 = vrot.slane %v575_v54, 4  ;;  %v576_v58 = vrot.slane %v573_v55, 4  ;;  %920 = vmatprep.mubr.msk.bf16.mxu1 %vm974_vm0, %v967_v14 }
  0xaa   :  { %v580_v59 = vsel %vm161_vm5, %v575_v54, %v577_v57  ;;  %v578_v60 = vsel %vm66_vm1, %v576_v58, %v577_v57  ;;  %868 = vmatmul.mubr.msk.bf16.vlgmr.msra.gmra.mrb[0].mxu0 %vm342_vm11, %v1076_v50 }
  0xab   :  { %584 = vst [vmem:[#allocation2 + $0x20] sm:$0x3] %v580_v59  ;;  %v579_v61 = vsel %vm161_vm5, %v573_v55, %v578_v60  ;;  %v605_v62 = vpop.permute.xlu1 %604  ;;  %v603_v63 = vpop.permute.xlu0 %602  ;;  %796 = vmatprep.mubr.bf16.mxu0 %v975_v21 }
  0xac   :  { %583 = vst [vmem:[#allocation2 + $0x18] sm:$0x33] %v579_v61  ;;  %v607_v0 = vrot.slane %v605_v62, 4  ;;  %v606_v1 = vrot.slane %v603_v63, 4 }
  0xae   :  { %v610_v2 = vsel %vm192_vm6, %v605_v62, %v607_v0  ;;  %v608_v3 = vsel %vm66_vm1, %v606_v1, %v607_v0  ;;  %v953_v4 = vld [vmem:[#allocation2 + $0x8] ss:$12 sps:$4 sm:$0xff]  }
  0xaf   :  { %614 = vst [vmem:[#allocation2 + $0x20] sm:$0xc] %v610_v2  ;;  %v609_v5 = vsel %vm192_vm6, %v603_v63, %v608_v3  ;;  %v635_v6 = vpop.permute.xlu1 %634  ;;  %v633_v7 = vpop.permute.xlu0 %632  ;;  %v954_v8 = vld [vmem:[#allocation2] ss:$12 sps:$4 sm:$0xff]   ;;  %v956_v9 = vld [vmem:[#allocation2 + $0x4] ss:$12 sps:$4 sm:$0xff]   ;;  %915 = vmatpush3.bf16.msra.mxu1 %v953_v4 }
  0xb0   :  { %613 = vst [vmem:[#allocation2 + $0x18] sm:$0xcc] %v609_v5  ;;  %v637_v10 = vrot.slane %v635_v6, 4  ;;  %v636_v11 = vrot.slane %v633_v7, 4  ;;  %764 = vmatprep.subr.bf16.mxu0 %v956_v9  ;;  %916 = vmatprep.subr.bf16.mxu1 %v967_v14 }
  0xb1   :  { %765 = vmatpush1.bf16.msra.mxu0 %v954_v8 }
  0xb2   :  { %v640_v21 = vsel %vm223_vm7, %v635_v6, %v637_v10  ;;  %v638_v12 = vsel %vm66_vm1, %v636_v11, %v637_v10 }
  0xb3   :  { %644 = vst [vmem:[#allocation2 + $0x2c] sm:$0x3] %v640_v21  ;;  %v639_v13 = vsel %vm223_vm7, %v633_v7, %v638_v12  ;;  %v665_v15 = vpop.permute.xlu1 %664  ;;  %v663_v16 = vpop.permute.xlu0 %662 }
  0xb4   :  { %643 = vst [vmem:[#allocation2 + $0x24] sm:$0x33] %v639_v13  ;;  %v667_v17 = vrot.slane %v665_v15, 4  ;;  %v666_v18 = vrot.slane %v663_v16, 4 }
  0xb6   :  { %v670_v19 = vsel %vm254_vm8, %v665_v15, %v667_v17  ;;  %v668_v20 = vsel %vm66_vm1, %v666_v18, %v667_v17 }
  0xb7   :  { %674 = vst [vmem:[#allocation2 + $0x2c] sm:$0xc] %v670_v19  ;;  %v669_v22 = vsel %vm254_vm8, %v663_v16, %v668_v20  ;;  %v695_v23 = vpop.permute.xlu1 %694  ;;  %v693_v24 = vpop.permute.xlu0 %692 }
  0xb8   :  { %673 = vst [vmem:[#allocation2 + $0x24] sm:$0xcc] %v669_v22  ;;  %v697_v25 = vrot.slane %v695_v23, 4  ;;  %v696_v26 = vrot.slane %v693_v24, 4 }
  0xba   :  { %v700_v27 = vsel %vm285_vm9, %v695_v23, %v697_v25  ;;  %v698_v28 = vsel %vm66_vm1, %v696_v26, %v697_v25 }
  0xbb   :  { %704 = vst [vmem:[#allocation2 + $0x38] sm:$0x3] %v700_v27  ;;  %v699_v29 = vsel %vm285_vm9, %v693_v24, %v698_v28 }
  0xbc   :  { %703 = vst [vmem:[#allocation2 + $0x30] sm:$0x33] %v699_v29 }
  0xbe   :  { %v957_v30 = vld [vmem:[#allocation2 + $0x20] ss:$12 sps:$4 sm:$0xff]  }
  0xbf   :  { %v958_v31 = vld [vmem:[#allocation2 + $0x18] ss:$12 sps:$4 sm:$0xff]   ;;  %v960_v32 = vld [vmem:[#allocation2 + $0x1c] ss:$12 sps:$4 sm:$0xff]   ;;  %917 = vmatpush3.bf16.msra.mxu1 %v957_v30 }
  0xc0   :  { %766 = vmatprep.subr.bf16.mxu0 %v960_v32  ;;  %918 = vmatprep.subr.bf16.mxu1 %v967_v14 }
  0xc1   :  { %767 = vmatpush1.bf16.msra.mxu0 %v958_v31 }
  0xc2   :  { %v962_v33 = vld [vmem:[#allocation2 + $0x38] ss:$0 sps:$4 sm:$0x33]  }
  0xc3   :  { %v713_v34 = vld [vmem:[#allocation2 + $0x30] sm:$0x33]  ;;  %v762_v36 = vsel %vm346_vm10, %v962_v33, 0 }
  0xc4   :  { %v888_v35 = vcombine.high %v713_v34, %v713_v34  ;;  %v887_v37 = vcombine.low %v713_v34, %v713_v34  ;;  %919 = vmatpush3.bf16.msra.mxu1 %v762_v36 }
  0xc6   :  { %890 = vmatprep.subr.msk.bf16.mxu0 %vm346_vm10, %v888_v35  ;;  %v756_v38 = vsel %vm346_vm10, %v887_v37, 0 }
  0xc7   :  { %769 = vmatpush1.bf16.msra.mxu0 %v756_v38  ;;  %921 = vmatmul.mubr.msk.bf16.vlgmr.msra.gmra.mrb[4].mxu1 %vm342_vm11, %v1076_v50 }
  0xc8   :  { %v20_v14 = vpop.permute.xlu0 %19 }
  0xca   :  { %891 = vmatmul.mubr.msk.bf16.vlgmr.msra.gmra.mrb[4].mxu0 %vm342_vm11, %v1076_v50 }
 0x17a   :  { %v431_v39 = vpop.f32.mrb[0].mxu1 }
 0x17b   :  { %v912_v40 = vpop.f32.mrb[1].mxu1  ;;  %v432_v41 = vadd.f32 %v431_v39, %v20_v14 }
 0x17c   :  { %v434_v42 = vpop.f32.mrb[2].mxu1 }
 0x17d   :  { %v390_v43 = vpop.f32.mrb[0].mxu0  ;;  %v439_v44 = vmax.f32 %v432_v41, 0.0  ;;  %v913_v45 = vpop.f32.mrb[3].mxu1 }
 0x17e   :  { %v392_v46 = vpop.f32.mrb[1].mxu0  ;;  %v391_v47 = vadd.f32 %v390_v43, %v20_v14 }
 0x17f   :  { %v394_v48 = vpop.f32.mrb[2].mxu0  ;;  %v393_v49 = vadd.f32 %v392_v46, %v20_v14  ;;  %442 = vst [vmem:[%s1136_s3 + $0x10] sm:$0xff] %v439_v44 }
 0x180   :  { %v437_v51 = vmax.f32 %v391_v47, 0.0  ;;  %v395_v52 = vpop.f32.mrb[3].mxu0 }
 0x181   :  { %v438_v53 = vmax.f32 %v393_v49, 0.0 }
 0x182   :  { %440 = vst [vmem:[%s1136_s3] sm:$0xff] %v437_v51 }
 0x183   :  { %441 = vst [vmem:[%s1136_s3 + $0x8] sm:$0xff] %v438_v53 }
 0x19a   :  { %v839_v50 = vpop.f32.mrb[4].mxu1 }
 0x19b   :  { %v840_v54 = vadd.f32 %v839_v50, %v20_v14  ;;  %v922_v55 = vpop.f32.mrb[5].mxu1 }
 0x19c   :  { %v842_v57 = vpop.f32.mrb[6].mxu1 }
 0x19d   :  { %v798_v56 = vpop.f32.mrb[4].mxu0  ;;  %v847_v58 = vmax.f32 %v840_v54, 0.0  ;;  %v923_v61 = vpop.f32.mrb[7].mxu1 }
 0x19e   :  { %v799_v59 = vadd.f32 %v798_v56, %v20_v14  ;;  %v800_v60 = vpop.f32.mrb[5].mxu0 }
 0x19f   :  { %v801_v62 = vadd.f32 %v800_v60, %v20_v14  ;;  %v802_v63 = vpop.f32.mrb[6].mxu0  ;;  %895 = vst [vmem:[%s1136_s3 + $0x28] sm:$0xff] %v847_v58 }
 0x1a0   :  { %v845_v0 = vmax.f32 %v799_v59, 0.0  ;;  %v803_v1 = vpop.f32.mrb[7].mxu0 }
 0x1a1   :  { %v846_v2 = vmax.f32 %v801_v62, 0.0 }
 0x1a2   :  { %893 = vst [vmem:[%s1136_s3 + $0x18] sm:$0xff] %v845_v0 }
 0x1a3   :  { %894 = vst [vmem:[%s1136_s3 + $0x20] sm:$0xff] %v846_v2 }

</bundles_post_ra>
